<compile_context>
chip_gen: v5e
topology: v5e:2x2
jax: 0.10.0
libtpu: 0.0.40
codegen_flags: <defaults>
</compile_context>

<pallas_src>
import jax
import jax.numpy as jnp
from jax.experimental import pallas as pl
from jax.experimental.pallas import tpu as pltpu


def _vmem_capacity_bytes(default=64 << 20):
    """Physical VMEM per core, with a conservative (v7x) fallback."""
    try:
        info = pltpu.get_tpu_info()
        cap = getattr(info, "vmem_capacity_bytes", None)
        if cap:
            return int(cap)
    except Exception:
        pass
    return default


def _make_kernel(num_cols: int, block_cols: int, mask_cols: bool):
    def kernel(x_ref, o_ref, m_sc, s_sc, wz_sc):
        j = pl.program_id(1)                       # class-tile index (reduction)
        nj = pl.num_programs(1)

        @pl.when(j == 0)
        def _init():
            m_sc[...] = jnp.full_like(m_sc, -jnp.inf)
            s_sc[...] = jnp.zeros_like(s_sc)
            wz_sc[...] = jnp.zeros_like(wz_sc)

        # Stream in native dtype, upcast in-register.  Working set is bounded
        # by the class chunk (TB, CK), never (TB, C).
        x = x_ref[...].astype(jnp.float32)          # (TB, CK)

        if mask_cols:
            # Ragged last class tile: push padded columns to a huge-negative
            # *finite* value so exp underflows to exactly 0 (no inf/NaN).
            col_ids = j * block_cols + jax.lax.broadcasted_iota(
                jnp.int32, x.shape, 1)
            x = jnp.where(col_ids < num_cols, x, jnp.float32(-1e30))

        m_prev = m_sc[...]                          # (TB, 1)
        s_prev = s_sc[...]
        wz_prev = wz_sc[...]

        m_loc = jnp.max(x, axis=1, keepdims=True)   # (TB, 1)
        m_new = jnp.maximum(m_prev, m_loc)
        z = x - m_new                               # (TB, CK)
        ex = jnp.exp(z)                             # (TB, CK)
        sum_ex = jnp.sum(ex, axis=1, keepdims=True)           # (TB, 1)
        sum_exz = jnp.sum(ex * z, axis=1, keepdims=True)      # (TB, 1)

        # Rescale previous running stats to the new max (flash-softmax style):
        #   W' = exp(d) * (W + d * S) + sum(ex*z),  S' = exp(d) * S + sum(ex)
        # with d = m_prev - m_new.  First chunk: d = -inf; the select (not
        # arithmetic) guard drops the NaN from (-inf * 0).
        delta = m_prev - m_new
        alpha = jnp.exp(delta)                      # 0 on the first chunk
        carried = jnp.where(s_prev > 0.0,
                            alpha * (wz_prev + delta * s_prev),
                            jnp.float32(0.0))
        s_new = alpha * s_prev + sum_ex
        wz_new = carried + sum_exz

        m_sc[...] = m_new
        s_sc[...] = s_new
        wz_sc[...] = wz_new

        @pl.when(j == nj - 1)
        def _finalize():
            # sum_c p*logp = sum(ex*z)/s - log(s); only (TB,1) work here.
            # Padded rows of a ragged last batch tile produce garbage here,
            # but Pallas clips the ragged output writeback, so they are never
            # stored.
            o_ref[...] = wz_new / s_new - jnp.log(s_new)

    return kernel


def conditional_entropy_loss(x, *, block_rows=None, block_cols=None,
                             target_block_bytes: int = 4 << 20,
                             vmem_limit_bytes=None):
    """x: (B, C) logits -> scalar f32 loss (matches the PyTorch module)."""
    B, C = x.shape
    itemsize = x.dtype.itemsize

    # ---- generation-aware VMEM budget (sizing and compiler limit agree). ----
    if vmem_limit_bytes is None:
        cap = _vmem_capacity_bytes()                       # 128 MiB v5e/v6e, 64 MiB v7x
        vmem_limit_bytes = min(max(32 << 20, (cap * 3) // 4), 100 << 20)
    vmem_limit_bytes = int(vmem_limit_bytes)

    # ---- class tile: full row when it is cheap, else a lane-aligned chunk. ----
    if block_cols is None:
        max_row_bytes = 16 << 10                           # ~16 KiB of input per row chunk
        if C * itemsize <= max_row_bytes:
            ck = C
        else:
            ck = max(128, ((max_row_bytes // itemsize) // 128) * 128)
    else:
        ck = block_cols
    ck = min(ck, C)
    if ck < C:
        ck = max(128, (ck // 128) * 128)                   # lane multiple when tiling C
    mask_cols = (ck < C) and (C % ck != 0)

    # ---- batch tile: byte-targeted, bounded by the VMEM budget. ----
    if block_rows is None:
        tb = max(8, target_block_bytes // max(ck * itemsize, 1))
    else:
        tb = block_rows
    # Per-row VMEM: double-buffered native input chunk + ~4 f32 block temps
    # (x_f32, z, ex, ex*z) + (TB,1) stats.
    per_row_bytes = 2 * ck * itemsize + 4 * ck * 4 + 16
    vmem_budget = int(vmem_limit_bytes * 0.8)
    tb = min(tb, max(8, vmem_budget // max(per_row_bytes, 1)))
    tb = max(8, (tb // 8) * 8)                             # sublane multiple
    if tb >= B:
        tb = B                                             # full-extent block is always legal

    nb = pl.cdiv(B, tb)
    nc = pl.cdiv(C, ck)

    kernel = _make_kernel(C, ck, mask_cols)

    per_row = pl.pallas_call(
        kernel,
        out_shape=jax.ShapeDtypeStruct((B, 1), jnp.float32),
        grid=(nb, nc),
        in_specs=[pl.BlockSpec((tb, ck), lambda i, j: (i, j))],
        out_specs=pl.BlockSpec((tb, 1), lambda i, j: (i, 0)),
        scratch_shapes=[pltpu.VMEM((tb, 1), jnp.float32)] * 3,   # m, s, wz
        compiler_params=pltpu.CompilerParams(
            dimension_semantics=("parallel", "arbitrary"),
            vmem_limit_bytes=vmem_limit_bytes,
        ),
    )(x)

    # loss = -mean_b sum_c p*logp  (tiny reduce over (B,) done by XLA).
    return -jnp.mean(per_row)


def _reference(x):
    # Pure-JAX reference of the PyTorch forward.
    xf = x.astype(jnp.float32)
    logp = jax.nn.log_softmax(xf, axis=1)
    p = jax.nn.softmax(xf, axis=1)
    return -1.0 * jnp.mean(jnp.sum(p * logp, axis=1), axis=0)


if __name__ == "__main__":
    key = jax.random.PRNGKey(0)
    k1, k2, k3 = jax.random.split(key, 3)

    # Case 1: small f32 logits, single full block (B=8, C=128).
    x = jax.random.normal(k1, (8, 128), dtype=jnp.float32)
    loss = conditional_entropy_loss(x)
    jax.block_until_ready(loss)
    ref = _reference(x)
    assert jnp.allclose(loss, ref, atol=1e-4, rtol=1e-4), (loss, ref)

    # Case 2: bf16 streaming + ragged batch tiles (B=20, tile=8 -> 3 tiles,
    # 4 padded rows in the last tile), single class tile.
    x2 = jax.random.normal(k2, (20, 256), dtype=jnp.bfloat16)
    loss2 = conditional_entropy_loss(x2, block_rows=8)
    jax.block_until_ready(loss2)
    ref2 = _reference(x2)
    assert jnp.allclose(loss2, ref2, atol=1e-3, rtol=1e-3), (loss2, ref2)

    # Case 3: class-axis tiling with online softmax + ragged last class tile
    # (C=320, class tile 128 -> 3 class steps, 64 padded cols) + ragged rows.
    x3 = 3.0 * jax.random.normal(k3, (20, 320), dtype=jnp.float32)
    loss3 = conditional_entropy_loss(x3, block_rows=8, block_cols=128)
    jax.block_until_ready(loss3)
    ref3 = _reference(x3)
    assert jnp.allclose(loss3, ref3, atol=1e-4, rtol=1e-4), (loss3, ref3)

    print("KERNEL_OK")
</pallas_src>

<mosaic_0001>
module attributes {stable_mosaic.version = 11 : i64} {
  func.func @kernel(%arg0: i32, %arg1: i32, %arg2: memref<8x128xf32, #tpu.memory_space<vmem>>, %arg3: memref<8x1xf32, #tpu.memory_space<vmem>>, %arg4: memref<8x1xf32, #tpu.memory_space<vmem>>, %arg5: memref<8x1xf32, #tpu.memory_space<vmem>>, %arg6: memref<8x1xf32, #tpu.memory_space<vmem>>) attributes {dimension_semantics = [#tpu.dimension_semantics<parallel>, #tpu.dimension_semantics<arbitrary>], iteration_bounds = array<i64: 1, 1>, scalar_prefetch = 0 : i64, scratch_operands = 3 : i64, tpu.core_type = #tpu.core_type<tc>, window_params = [{transform_indices = @transform_0, window_bounds = array<i64: 8, 128>}, {transform_indices = @transform_1, window_bounds = array<i64: 8, 1>}]} {
    %c0_i32 = arith.constant 0 : i32
    %0 = arith.cmpi eq, %arg1, %c0_i32 : i32
    %1 = arith.extui %0 : i1 to i32
    %c0_i32_0 = arith.constant 0 : i32
    %2 = arith.cmpi ne, %1, %c0_i32_0 : i32
    scf.if %2 {
      %cst_20 = arith.constant 0xFF800000 : f32
      %36 = vector.broadcast %cst_20 : f32 to vector<8x1xf32>
      %c0_21 = arith.constant 0 : index
      %c0_22 = arith.constant 0 : index
      %37 = vector.load %arg4[%c0_21, %c0_22] : memref<8x1xf32, #tpu.memory_space<vmem>>, vector<8x1xf32>
      tpu.vector_store %arg4[%c0_21, %c0_22], %36 {strides = array<i32>} : memref<8x1xf32, #tpu.memory_space<vmem>>, vector<8x1xf32>,
      %cst_23 = arith.constant 0.000000e+00 : f32
      %38 = vector.broadcast %cst_23 : f32 to vector<8x1xf32>
      %c0_24 = arith.constant 0 : index
      %c0_25 = arith.constant 0 : index
      %39 = vector.load %arg5[%c0_24, %c0_25] : memref<8x1xf32, #tpu.memory_space<vmem>>, vector<8x1xf32>
      tpu.vector_store %arg5[%c0_24, %c0_25], %38 {strides = array<i32>} : memref<8x1xf32, #tpu.memory_space<vmem>>, vector<8x1xf32>,
      %cst_26 = arith.constant 0.000000e+00 : f32
      %40 = vector.broadcast %cst_26 : f32 to vector<8x1xf32>
      %c0_27 = arith.constant 0 : index
      %c0_28 = arith.constant 0 : index
      %41 = vector.load %arg6[%c0_27, %c0_28] : memref<8x1xf32, #tpu.memory_space<vmem>>, vector<8x1xf32>
      tpu.vector_store %arg6[%c0_27, %c0_28], %40 {strides = array<i32>} : memref<8x1xf32, #tpu.memory_space<vmem>>, vector<8x1xf32>,
    } else {
    }
    %c0 = arith.constant 0 : index
    %c0_1 = arith.constant 0 : index
    %3 = vector.load %arg2[%c0, %c0_1] : memref<8x128xf32, #tpu.memory_space<vmem>>, vector<8x128xf32>
    %c0_2 = arith.constant 0 : index
    %c0_3 = arith.constant 0 : index
    %4 = vector.load %arg4[%c0_2, %c0_3] : memref<8x1xf32, #tpu.memory_space<vmem>>, vector<8x1xf32>
    %c0_4 = arith.constant 0 : index
    %c0_5 = arith.constant 0 : index
    %5 = vector.load %arg5[%c0_4, %c0_5] : memref<8x1xf32, #tpu.memory_space<vmem>>, vector<8x1xf32>
    %c0_6 = arith.constant 0 : index
    %c0_7 = arith.constant 0 : index
    %6 = vector.load %arg6[%c0_6, %c0_7] : memref<8x1xf32, #tpu.memory_space<vmem>>, vector<8x1xf32>
    %cst = arith.constant dense<0xFF800000> : vector<8xf32>
    %7 = vector.multi_reduction <maximumf>, %3, %cst [1] : vector<8x128xf32> to vector<8xf32>
    %8 = vector.shape_cast %7 : vector<8xf32> to vector<8x1xf32>
    %9 = arith.maximumf %4, %8 : vector<8x1xf32>
    %10 = vector.broadcast %9 : vector<8x1xf32> to vector<8x128xf32>
    %11 = arith.subf %3, %10 : vector<8x128xf32>
    %12 = math.exp %11 : vector<8x128xf32>
    %cst_8 = arith.constant dense<0.000000e+00> : vector<8xf32>
    %13 = vector.multi_reduction <add>, %12, %cst_8 [1] : vector<8x128xf32> to vector<8xf32>
    %14 = vector.shape_cast %13 : vector<8xf32> to vector<8x1xf32>
    %15 = arith.mulf %12, %11 : vector<8x128xf32>
    %cst_9 = arith.constant dense<0.000000e+00> : vector<8xf32>
    %16 = vector.multi_reduction <add>, %15, %cst_9 [1] : vector<8x128xf32> to vector<8xf32>
    %17 = vector.shape_cast %16 : vector<8xf32> to vector<8x1xf32>
    %18 = arith.subf %4, %9 : vector<8x1xf32>
    %19 = math.exp %18 : vector<8x1xf32>
    %cst_10 = arith.constant 0.000000e+00 : f32
    %20 = vector.broadcast %cst_10 : f32 to vector<8x1xf32>
    %21 = arith.cmpf ogt, %5, %20 : vector<8x1xf32>
    %22 = arith.mulf %18, %5 : vector<8x1xf32>
    %23 = arith.addf %6, %22 : vector<8x1xf32>
    %24 = arith.mulf %19, %23 : vector<8x1xf32>
    %cst_11 = arith.constant 0.000000e+00 : f32
    %25 = vector.broadcast %cst_11 : f32 to vector<8x1xf32>
    %26 = arith.select %21, %24, %25 : vector<8x1xi1>, vector<8x1xf32>
    %27 = arith.mulf %19, %5 : vector<8x1xf32>
    %28 = arith.addf %27, %14 : vector<8x1xf32>
    %29 = arith.addf %26, %17 : vector<8x1xf32>
    %c0_12 = arith.constant 0 : index
    %c0_13 = arith.constant 0 : index
    %30 = vector.load %arg4[%c0_12, %c0_13] : memref<8x1xf32, #tpu.memory_space<vmem>>, vector<8x1xf32>
    tpu.vector_store %arg4[%c0_12, %c0_13], %9 {strides = array<i32>} : memref<8x1xf32, #tpu.memory_space<vmem>>, vector<8x1xf32>,
    %c0_14 = arith.constant 0 : index
    %c0_15 = arith.constant 0 : index
    %31 = vector.load %arg5[%c0_14, %c0_15] : memref<8x1xf32, #tpu.memory_space<vmem>>, vector<8x1xf32>
    tpu.vector_store %arg5[%c0_14, %c0_15], %28 {strides = array<i32>} : memref<8x1xf32, #tpu.memory_space<vmem>>, vector<8x1xf32>,
    %c0_16 = arith.constant 0 : index
    %c0_17 = arith.constant 0 : index
    %32 = vector.load %arg6[%c0_16, %c0_17] : memref<8x1xf32, #tpu.memory_space<vmem>>, vector<8x1xf32>
    tpu.vector_store %arg6[%c0_16, %c0_17], %29 {strides = array<i32>} : memref<8x1xf32, #tpu.memory_space<vmem>>, vector<8x1xf32>,
    %c0_i32_18 = arith.constant 0 : i32
    %33 = arith.cmpi eq, %arg1, %c0_i32_18 : i32
    %34 = arith.extui %33 : i1 to i32
    %c0_i32_19 = arith.constant 0 : i32
    %35 = arith.cmpi ne, %34, %c0_i32_19 : i32
    scf.if %35 {
      %36 = arith.divf %29, %28 : vector<8x1xf32>
      %37 = math.log %28 : vector<8x1xf32>
      %38 = arith.subf %36, %37 : vector<8x1xf32>
      %c0_20 = arith.constant 0 : index
      %c0_21 = arith.constant 0 : index
      %39 = vector.load %arg3[%c0_20, %c0_21] : memref<8x1xf32, #tpu.memory_space<vmem>>, vector<8x1xf32>
      tpu.vector_store %arg3[%c0_20, %c0_21], %38 {strides = array<i32>} : memref<8x1xf32, #tpu.memory_space<vmem>>, vector<8x1xf32>,
    } else {
    }
    return
  }
  func.func @transform_0(%arg0: i32, %arg1: i32) -> (i32, i32) {
    %c0_i32 = arith.constant 0 : i32
    return %arg0, %arg1 : i32, i32
  }
  func.func @transform_1(%arg0: i32, %arg1: i32) -> (i32, i32) {
    %c0_i32 = arith.constant 0 : i32
    %c0_i32_0 = arith.constant 0 : i32
    return %arg0, %c0_i32 : i32, i32
  }
}

</mosaic_0001>

<bundles_post_ra>
// kernel: tpu_custom_call.1
= control target key start
LH: loop header
LB: loop body
LE: loop exit
PB: predicated region body
PF: predicated region fallthrough
CT: control target
= control target key end

     0   :  { %6 = vsyncpa [#allocation6], 0  ;;  %s131_s9 = smov [#allocation5]   ;;  %s158_s0 = inlined_call_operand.hbm [shape: f32[8,128], index: 0, kind: input, shape index: {}]   ;;  %s159_s1 = inlined_call_operand.vmem [shape: f32[8,1], index: 1, kind: output, shape index: {}]  }
   0x1   :  { %s12_s8 = sshll.u32 %s158_s0, 4  ;;  %s14_s10 = sshll.u32 %s131_s9, 4  ;;  %s13_s8 = int_to_ptr.hbm [resolvable:$true] %s12_s8  ;;  %s15_s10 = int_to_ptr.vmem [resolvable:$true] %s14_s10 }
   0x2   :  { %17 = dma.hbm_to_vmem [thread:$0]  %s13_s8, 128, %s15_s10, [#allocation6]  }
   0x3   :  { %129 = dma.done.wait [#allocation6], 128  }
   0x4   :  { %130 = vsyncadd [#allocation6], 4294967168  ;;  %vm26_vm0 = vcmask 7168   ;;  %v132_v0 = vmov -inf   ;;  %v30_v1 = vld [vmem:[#allocation5] sm:$0xff]  ;;  %v133_v2 = vmov 0.0  }
   0x5   :  { %27 = vst.msk [vmem:[#allocation2] sm:$0xff] %vm26_vm0, %v132_v0  ;;  %34 = vmax.xlane.f32.xlu0 %v30_v1  ;;  %v134_v3 = vmov 0  }
   0x6   :  { %28 = vst.msk [vmem:[#allocation3] sm:$0xff] %vm26_vm0, %v133_v2  ;;  %96 = vset.pattern.permute.xlu0 %v134_v3 }
   0x7   :  { %29 = vst.msk [vmem:[#allocation4] sm:$0xff] %vm26_vm0, %v133_v2 }
   0xc   :  { %v31_v4 = vld [vmem:[#allocation2] sm:$0xff] }
   0xd   :  { %v32_v14 = vld [vmem:[#allocation3] sm:$0xff] }
   0xe   :  { %v33_v18 = vld [vmem:[#allocation4] sm:$0xff]  ;;  %vm53_vm1 = vcmp.gt.f32.partialorder %v32_v14, 0.0 }
  0x78   :  { %v35_v5 = vpop.xlane.xlu0 %34 }
  0x79   :  { %v36_v6 = vmax.f32 %v31_v4, %v35_v5 }
  0x7b   :  { %v50_v7 = vsub.f32 %v31_v4, %v36_v6  ;;  %62 = vst.msk [vmem:[#allocation2] sm:$0xff] %vm26_vm0, %v36_v6  ;;  %39 = vperm.xlu0 %96, %v36_v6  }
  0x7d   :  { %v51_v13 = vmul.f32 1.442695, %v50_v7  ;;  %v54_v16 = vmul.f32 %v50_v7, %v32_v14 }
  0x7f   :  { %v55_v21 = vadd.f32 %v54_v16, %v33_v18 }
  0xed   :  { %v40_v8 = vpop.permute.xlu0 %39 }
  0xee   :  { %v42_v9 = vsub.f32 %v30_v1, %v40_v8 }
  0xf0   :  { %v43_v10 = vmul.f32 1.442695, %v42_v9 }
  0xf2   :  { %97 = vpow2.f32 %v43_v10 }
  0xf3   :  { %99 = vpow2.f32 %v51_v13 }
  0xf8   :  { %v98_v11 = vpop.eup %97 }
  0xf9   :  { %45 = vadd.xlane.f32.xlu1 %v98_v11  ;;  %v47_v12 = vmul.f32 %v98_v11, %v42_v9  ;;  %v100_v15 = vpop.eup %99 }
  0xfa   :  { %v58_v17 = vmul.f32 %v100_v15, %v32_v14  ;;  %v56_v22 = vmul.f32 %v100_v15, %v55_v21 }
  0xfc   :  { %v57_v24 = vsel %vm53_vm1, %v56_v22, 0.0 }
 0x101   :  { %48 = vadd.xlane.f32.xlu1 %v47_v12 }
 0x16c   :  { %v46_v19 = vpop.xlane.xlu1 %45 }
 0x16d   :  { %v59_v20 = vadd.f32 %v58_v17, %v46_v19 }
 0x16f   :  { %63 = vst.msk [vmem:[#allocation3] sm:$0xff] %vm26_vm0, %v59_v20  ;;  %101 = vrcp.f32 %v59_v20  ;;  %v79_v29 = vand.u32 2147483648, %v59_v20  ;;  %v77_v31 = vand.u32 2147483647, %v59_v20  ;;  %vm73_vm3 = vweird.f32 %v59_v20 }
 0x170   :  { %103 = vlog2.f32 %v59_v20 }
 0x171   :  { %v80_v34 = vor.u32 1.1754944e-38, %v79_v29  ;;  %vm78_vm5 = vcmp.eq.f32.partialorder %v77_v31, 8.507059e+37 }
 0x174   :  { %v49_v23 = vpop.xlane.xlu1 %48 }
 0x175   :  { %v102_v25 = vpop.eup %101  ;;  %v60_v26 = vadd.f32 %v57_v24, %v49_v23 }
 0x176   :  { %v69_v27 = vmul.f32 %v102_v25, %v59_v20  ;;  %vm74_vm2 = vweird.f32 %v102_v25  ;;  %v104_v33 = vpop.eup %103 }
 0x177   :  { %64 = vst.msk [vmem:[#allocation4] sm:$0xff] %vm26_vm0, %v60_v26  ;;  %vm75_vm4 = vmor %vm73_vm3, %vm74_vm2  ;;  %v84_v38 = vmul.f32 0.6931472, %v104_v33 }
 0x178   :  { %v70_v28 = vsub.f32 1.0, %v69_v27 }
 0x17a   :  { %v71_v30 = vmul.f32 %v102_v25, %v70_v28 }
 0x17c   :  { %v72_v32 = vadd.f32 %v102_v25, %v71_v30 }
 0x17e   :  { %v76_v35 = vsel %vm75_vm4, %v102_v25, %v72_v32 }
 0x17f   :  { %v81_v36 = vsel %vm78_vm5, %v80_v34, %v76_v35 }
 0x180   :  { %v82_v37 = vmul.f32 %v81_v36, %v60_v26 }
 0x182   :  { %v85_v39 = vsub.f32 %v82_v37, %v84_v38 }
 0x184   :  { %86 = vst.msk [vmem:[%s159_s1] sm:$0xff] %vm26_vm0, %v85_v39 }
 0x185   :  { %91 = vsyncpa [#allocation6], 1 }

</bundles_post_ra>
